<compile_context>
chip_gen: v7x
topology: tpu7x:2x2x1
jax: 0.10.0
libtpu: 0.0.40
codegen_flags: <defaults>
</compile_context>

<pallas_src>
import jax
import jax.numpy as jnp
from jax.experimental import pallas as pl
from jax.experimental.pallas import tpu as pltpu


def _round_up(x, m):
    return ((x + m - 1) // m) * m


# Per-generation cost-model constants:
#   (bf16 MXU flop/s per TensorCore, HBM bytes/s, TensorCores per chip that
#    the "parallel" grid axes can shard across).
_GEN_TABLE = {
    "v5e": (197e12, 0.82e12, 1),
    "v6e": (918e12, 1.35e12, 1),
    "v7x": (996e12, 3.20e12, 2),
}

_STEP_OVERHEAD_S = 0.35e-6               # fixed per-grid-step cost
_VMEM_TILE_BUDGET = 32 * 1024 * 1024     # cap on double-buffered working set


def _tpu_generation():
    """Best-effort chip-generation guess; only feeds the tile-choice cost
    model (never correctness).  Falls back to v6e-like constants."""
    try:
        info = pltpu.get_tpu_info()
        vmem = int(info.vmem_capacity_bytes)
    except Exception:
        return "v6e"
    if vmem <= 64 * 1024 * 1024:
        return "v7x"  # 64 MiB VMEM per TensorCore, 2 TCs per chip
    name = ""
    for attr in ("chip_version", "version", "chip_name", "name"):
        try:
            val = getattr(info, attr, None)
        except Exception:
            val = None
        if val is not None:
            name = str(val).lower()
            if name:
                break
    if "5" in name:
        return "v5e"
    return "v6e"


def _tile_candidates(dim, unit, max_tile):
    """Descending tile candidates: power-of-two fractions of max_tile (all
    multiples of `unit`), clamped to the unit-rounded dimension."""
    dim_u = _round_up(dim, unit)
    cands = set()
    t = max_tile
    while t >= unit:
        cands.add(min(t, dim_u))
        t //= 2
    return sorted(cands, reverse=True)


def _vmem_bytes(tm, tn, tk, cdt_size, out_size, use_scratch):
    # Double-buffered input tiles + double-buffered output tile + bias (+acc).
    ws = 2 * (tm * tk + tk * tn) * cdt_size + 2 * tm * tn * out_size + 2 * tn * 4
    if use_scratch:
        ws += tm * tn * 4
    return ws


def _choose_tiles(M, N, K, unit_m, cdt_size, out_size, use_scratch):
    """Pick (tm, tn, tk) minimizing max(MXU time, HBM time) + 0.35us * steps,
    subject to the double-buffered working set fitting the VMEM budget.
    Larger tiles win ties (candidates are descending, comparison is strict);
    padded tail-tile work and per-tile operand re-reads are charged; on v7x
    the parallel (M, N) axes are credited with up to 2 TensorCores."""
    mxu_rate, hbm_rate, n_cores = _GEN_TABLE[_tpu_generation()]

    cand_m = _tile_candidates(M, unit_m, 512)
    cand_n = _tile_candidates(N, 128, 512)
    cand_k = _tile_candidates(K, 128, 2048)

    best_cost, best = None, None
    for tm in cand_m:
        for tn in cand_n:
            for tk in cand_k:
                if _vmem_bytes(tm, tn, tk, cdt_size, out_size,
                               use_scratch) > _VMEM_TILE_BUDGET:
                    continue
                Mp = _round_up(M, tm)
                Np = _round_up(N, tn)
                Kp = _round_up(K, tk)
                gm, gn, gk = Mp // tm, Np // tn, Kp // tk
                cores = min(n_cores, gm * gn)
                mxu = 2.0 * Mp * Np * Kp / mxu_rate / cores
                hbm = ((Mp * Kp * gn + Kp * Np * gm) * cdt_size
                       + Mp * Np * out_size) / hbm_rate
                cost = max(mxu, hbm) + gm * gn * gk * _STEP_OVERHEAD_S / cores
                if best_cost is None or cost < best_cost:
                    best_cost, best = cost, (tm, tn, tk)
    assert best is not None
    return best


def _linear_kernel(x_ref, w_ref, b_ref, o_ref, *acc_scratch):
    # x_ref: [tm, tk] (compute dtype)
    # w_ref: [tk, tn] (compute dtype; weight pre-transposed in the wrapper so
    #                  this is a plain MXU matmul, no per-step XLU transpose)
    # b_ref: [1, tn]  (f32)
    # o_ref: [tm, tn] (original dtype)
    # When o_ref is f32 it doubles as the accumulator — its block index
    # ignores k, so it stays VMEM-resident across the reduction axis.
    acc_ref = acc_scratch[0] if acc_scratch else o_ref
    k = pl.program_id(2)

    @pl.when(k == 0)
    def _():
        acc_ref[...] = jnp.zeros_like(acc_ref)

    acc_ref[...] += jnp.dot(x_ref[...], w_ref[...],
                            preferred_element_type=jnp.float32)

    # Bias add + cast + HBM writeback only once per output tile.
    @pl.when(k == pl.num_programs(2) - 1)
    def _():
        o_ref[...] = (acc_ref[...] + b_ref[...]).astype(o_ref.dtype)


def pallas_linear(x2d, weight, bias, *, compute_dtype=jnp.bfloat16):
    """y = x2d @ weight.T + bias via a tiled Pallas matmul.

    x2d:    [M, K]
    weight: [N, K]   (PyTorch nn.Linear layout)
    bias:   [N]
    compute_dtype: MXU operand dtype (bf16 by default; pass jnp.float32 for
                   full parity with an f32 PyTorch reference).
    """
    M, K = x2d.shape
    N, K2 = weight.shape
    assert K == K2, (K, K2)

    out_dt = jnp.dtype(x2d.dtype)
    cdt = jnp.dtype(compute_dtype)
    use_scratch = out_dt != jnp.dtype(jnp.float32)

    # Sublane granularity: 8 rows for 32-bit, 16 for 16-bit, 32 for 8-bit.
    # tm must satisfy both the compute-dtype input tile and out-dtype output.
    unit_m = max(32 // cdt.itemsize, 32 // out_dt.itemsize)

    tm, tn, tk = _choose_tiles(M, N, K, unit_m, cdt.itemsize, out_dt.itemsize,
                               use_scratch)
    Mp, Np, Kp = _round_up(M, tm), _round_up(N, tn), _round_up(K, tk)

    # One-time operand prep (XLA fuses cast + transpose + pad into one pass):
    #  * cast to the compute dtype (halves HBM traffic / VMEM for bf16),
    #  * pre-transpose weight to [K, N] so the kernel needs no transpose,
    #  * zero-pad to tile multiples (exact for the matmul; sliced off below).
    x_c = x2d.astype(cdt)
    w_t = weight.T.astype(cdt)
    b_f = bias.astype(jnp.float32)
    if (Mp, Kp) != (M, K):
        x_c = jnp.pad(x_c, ((0, Mp - M), (0, Kp - K)))
    if (Kp, Np) != (K, N):
        w_t = jnp.pad(w_t, ((0, Kp - K), (0, Np - N)))
    if Np != N:
        b_f = jnp.pad(b_f, (0, Np - N))
    b2d = b_f.reshape(1, Np)

    grid = (Mp // tm, Np // tn, Kp // tk)
    scratch_shapes = ([pltpu.VMEM((tm, tn), jnp.float32)] if use_scratch else [])

    ws_bytes = _vmem_bytes(tm, tn, tk, cdt.itemsize, out_dt.itemsize, use_scratch)
    vmem_limit = None
    if ws_bytes > 12 * 1024 * 1024:
        # Above v5e's 16 MiB scoped default -> raise it, capped well below the
        # smallest physical VMEM (64 MiB on v7x).
        vmem_limit = min(ws_bytes + 12 * 1024 * 1024, 48 * 1024 * 1024)

    out = pl.pallas_call(
        _linear_kernel,
        out_shape=jax.ShapeDtypeStruct((Mp, Np), out_dt),
        grid_spec=pltpu.PrefetchScalarGridSpec(
            num_scalar_prefetch=0,
            grid=grid,
            in_specs=[
                pl.BlockSpec((tm, tk), lambda i, j, k: (i, k)),
                pl.BlockSpec((tk, tn), lambda i, j, k: (k, j)),
                pl.BlockSpec((1, tn), lambda i, j, k: (0, j)),
            ],
            out_specs=pl.BlockSpec((tm, tn), lambda i, j, k: (i, j)),
            scratch_shapes=scratch_shapes,
        ),
        compiler_params=pltpu.CompilerParams(
            dimension_semantics=("parallel", "parallel", "arbitrary"),
            vmem_limit_bytes=vmem_limit),
        cost_estimate=pl.CostEstimate(
            flops=2 * Mp * Np * Kp,
            transcendentals=0,
            bytes_accessed=((Mp * Kp * (Np // tn) + Kp * Np * (Mp // tm))
                            * cdt.itemsize
                            + Mp * Np * out_dt.itemsize + Np * 4)),
    )(x_c, w_t, b2d)

    if (Mp, Np) != (M, N):
        out = out[:M, :N]
    return out


def gradient_blocker_forward(state, weight, bias):
    """Forward of GradientBlocker(nn.Linear(hidden, out)).

    state:  [batch, seq, hidden]
    weight: [out, hidden]   (PyTorch Linear layout)
    bias:   [out]
    returns [batch, seq, out], with gradients blocked (torch.no_grad()).
    """
    B, S, H = state.shape
    O = weight.shape[0]
    x2d = state.reshape(B * S, H)
    y2d = pallas_linear(x2d, weight, bias)
    y = y2d.reshape(B, S, O)
    # torch.no_grad() semantics: value passes through, gradient is blocked.
    # TODO(synk): GradientBlocker wraps an *arbitrary* layer; only the Linear
    # feed-forward case is implemented here.
    return jax.lax.stop_gradient(y)


if __name__ == "__main__":
    key = jax.random.PRNGKey(0)
    k_x, k_w, k_b = jax.random.split(key, 3)

    batch, seq, hidden, out = 2, 8, 32, 32
    state = jax.random.normal(k_x, (batch, seq, hidden), dtype=jnp.float32)
    # Deterministic parameter init (nn.Linear-style uniform bound 1/sqrt(hidden)).
    bound = 1.0 / (hidden ** 0.5)
    weight = jax.random.uniform(k_w, (out, hidden), jnp.float32, -bound, bound)
    bias = jax.random.uniform(k_b, (out,), jnp.float32, -bound, bound)

    fwd = jax.jit(gradient_blocker_forward)
    y = fwd(state, weight, bias)
    jax.block_until_ready(y)

    # Reference check in plain JAX (tolerance loosened for bf16 MXU compute).
    y_ref = state.reshape(-1, hidden) @ weight.T + bias
    y_ref = y_ref.reshape(batch, seq, out)
    assert y.shape == y_ref.shape, (y.shape, y_ref.shape)
    assert jnp.allclose(y, y_ref, atol=2e-2, rtol=2e-2), "mismatch vs reference"
    print("KERNEL_OK")
</pallas_src>

<mosaic_0001>
module attributes {stable_mosaic.version = 11 : i64} {
  func.func @_linear_kernel(%arg0: i32, %arg1: i32, %arg2: i32, %arg3: memref<16x128xbf16, #tpu.memory_space<vmem>>, %arg4: memref<128x128xbf16, #tpu.memory_space<vmem>>, %arg5: memref<1x128xf32, #tpu.memory_space<vmem>>, %arg6: memref<16x128xf32, #tpu.memory_space<vmem>>) attributes {dimension_semantics = [#tpu.dimension_semantics<parallel>, #tpu.dimension_semantics<parallel>, #tpu.dimension_semantics<arbitrary>], iteration_bounds = array<i64: 1, 1, 1>, scalar_prefetch = 0 : i64, scratch_operands = 0 : i64, tpu.core_type = #tpu.core_type<tc>, window_params = [{transform_indices = @transform_0, window_bounds = array<i64: 16, 128>}, {transform_indices = @transform_1, window_bounds = array<i64: 128, 128>}, {transform_indices = @transform_2, window_bounds = array<i64: 1, 128>}, {transform_indices = @transform_3, window_bounds = array<i64: 16, 128>}]} {
    %c0_i32 = arith.constant 0 : i32
    %0 = arith.cmpi eq, %arg2, %c0_i32 : i32
    %1 = arith.extui %0 : i1 to i32
    %c0_i32_0 = arith.constant 0 : i32
    %2 = arith.cmpi ne, %1, %c0_i32_0 : i32
    scf.if %2 {
      %cst_10 = arith.constant 0.000000e+00 : f32
      %12 = vector.broadcast %cst_10 : f32 to vector<16x128xf32>
      %c0_11 = arith.constant 0 : index
      %c0_12 = arith.constant 0 : index
      %13 = vector.load %arg6[%c0_11, %c0_12] : memref<16x128xf32, #tpu.memory_space<vmem>>, vector<16x128xf32>
      tpu.vector_store %arg6[%c0_11, %c0_12], %12 {strides = array<i32>} : memref<16x128xf32, #tpu.memory_space<vmem>>, vector<16x128xf32>,
    } else {
    }
    %c0 = arith.constant 0 : index
    %c0_1 = arith.constant 0 : index
    %3 = vector.load %arg6[%c0, %c0_1] : memref<16x128xf32, #tpu.memory_space<vmem>>, vector<16x128xf32>
    %c0_2 = arith.constant 0 : index
    %c0_3 = arith.constant 0 : index
    %4 = vector.load %arg3[%c0_2, %c0_3] : memref<16x128xbf16, #tpu.memory_space<vmem>>, vector<16x128xbf16>
    %c0_4 = arith.constant 0 : index
    %c0_5 = arith.constant 0 : index
    %5 = vector.load %arg4[%c0_4, %c0_5] : memref<128x128xbf16, #tpu.memory_space<vmem>>, vector<128x128xbf16>
    %cst = arith.constant dense<0.000000e+00> : vector<16x128xf32>
    %6 = tpu.matmul %4, %5, %cst {dimension_numbers = #tpu.dot_dimension_numbers<[1], [0], [0], [1], [0, 0, 1, 1], [], []>} : vector<16x128xbf16>, vector<128x128xbf16>, vector<16x128xf32> -> vector<16x128xf32>
    %7 = arith.addf %3, %6 : vector<16x128xf32>
    %c0_6 = arith.constant 0 : index
    %c0_7 = arith.constant 0 : index
    %8 = vector.load %arg6[%c0_6, %c0_7] : memref<16x128xf32, #tpu.memory_space<vmem>>, vector<16x128xf32>
    tpu.vector_store %arg6[%c0_6, %c0_7], %7 {strides = array<i32>} : memref<16x128xf32, #tpu.memory_space<vmem>>, vector<16x128xf32>,
    %c0_i32_8 = arith.constant 0 : i32
    %9 = arith.cmpi eq, %arg2, %c0_i32_8 : i32
    %10 = arith.extui %9 : i1 to i32
    %c0_i32_9 = arith.constant 0 : i32
    %11 = arith.cmpi ne, %10, %c0_i32_9 : i32
    scf.if %11 {
      %c0_10 = arith.constant 0 : index
      %c0_11 = arith.constant 0 : index
      %12 = vector.load %arg6[%c0_10, %c0_11] : memref<16x128xf32, #tpu.memory_space<vmem>>, vector<16x128xf32>
      %c0_12 = arith.constant 0 : index
      %c0_13 = arith.constant 0 : index
      %13 = vector.load %arg5[%c0_12, %c0_13] : memref<1x128xf32, #tpu.memory_space<vmem>>, vector<1x128xf32>
      %14 = vector.broadcast %13 : vector<1x128xf32> to vector<16x128xf32>
      %15 = arith.addf %12, %14 : vector<16x128xf32>
      %c0_14 = arith.constant 0 : index
      %c0_15 = arith.constant 0 : index
      %16 = vector.load %arg6[%c0_14, %c0_15] : memref<16x128xf32, #tpu.memory_space<vmem>>, vector<16x128xf32>
      tpu.vector_store %arg6[%c0_14, %c0_15], %15 {strides = array<i32>} : memref<16x128xf32, #tpu.memory_space<vmem>>, vector<16x128xf32>,
    } else {
    }
    return
  }
  func.func @transform_0(%arg0: i32, %arg1: i32, %arg2: i32) -> (i32, i32) {
    %c0_i32 = arith.constant 0 : i32
    return %arg0, %arg2 : i32, i32
  }
  func.func @transform_1(%arg0: i32, %arg1: i32, %arg2: i32) -> (i32, i32) {
    %c0_i32 = arith.constant 0 : i32
    return %arg2, %arg1 : i32, i32
  }
  func.func @transform_2(%arg0: i32, %arg1: i32, %arg2: i32) -> (i32, i32) {
    %c0_i32 = arith.constant 0 : i32
    %c0_i32_0 = arith.constant 0 : i32
    return %c0_i32, %arg1 : i32, i32
  }
  func.func @transform_3(%arg0: i32, %arg1: i32, %arg2: i32) -> (i32, i32) {
    %c0_i32 = arith.constant 0 : i32
    return %arg0, %arg1 : i32, i32
  }
}

</mosaic_0001>

<bundles_post_ra>
// kernel: gradient_blocker_forward.1
= control target key start
LH: loop header
LB: loop body
LE: loop exit
PB: predicated region body
PF: predicated region fallthrough
CT: control target
= control target key end

     0   :  { %v210_v0 = vmov 0.0   ;;  %vm211_vm0 = vmmov 0   ;;  %s268_s1 = inlined_call_operand.vmem [shape: bf16[128,128], index: 1, kind: input, shape index: {}]   ;;  %s269_s0 = inlined_call_operand.vmem [shape: bf16[16,128], index: 0, kind: input, shape index: {}]   ;;  %s270_s2 = inlined_call_operand.vmem [shape: f32[1,128], index: 2, kind: input, shape index: {}]   ;;  %s271_s3 = inlined_call_operand.vmem [shape: f32[16,128], index: 3, kind: output, shape index: {}]  }
   0x1   :  { %179 = vmatprep.subr.bf16.mxu0 %v210_v0  ;;  %v201_v1 = vld [vmem:[%s268_s1] sm:$0xff]   ;;  %195 = vmatprep.mubr.msk.bf16.mxu0 %vm211_vm0, %v210_v0  ;;  %v202_v2 = vld [vmem:[%s268_s1 + $0x8] sm:$0xff]   ;;  %v203_v3 = vld [vmem:[%s268_s1 + $0x10] sm:$0xff]  }
   0x2   :  { %180 = vmatpush3.bf16.msra.mxu0 %v201_v1  ;;  %v204_v4 = vld [vmem:[%s268_s1 + $0x18] sm:$0xff]   ;;  %v205_v5 = vld [vmem:[%s268_s1 + $0x20] sm:$0xff]   ;;  %v206_v6 = vld [vmem:[%s268_s1 + $0x28] sm:$0xff]  }
   0x3   :  { %181 = vmatprep.subr.bf16.mxu0 %v210_v0  ;;  %v207_v7 = vld [vmem:[%s268_s1 + $0x30] sm:$0xff]   ;;  %v208_v8 = vld [vmem:[%s268_s1 + $0x38] sm:$0xff]   ;;  %v209_v9 = vld [vmem:[%s269_s0] sm:$0xff]  }
   0x4   :  { %v169_v11 = vld [vmem:[%s270_s2] ss:$0 sm:$0xff] }
   0x6   :  { %182 = vmatpush3.bf16.msra.mxu0 %v202_v2 }
   0x7   :  { %183 = vmatprep.subr.bf16.mxu0 %v210_v0 }
   0xa   :  { %184 = vmatpush3.bf16.msra.mxu0 %v203_v3 }
   0xb   :  { %185 = vmatprep.subr.bf16.mxu0 %v210_v0 }
   0xe   :  { %186 = vmatpush3.bf16.msra.mxu0 %v204_v4 }
   0xf   :  { %187 = vmatprep.subr.bf16.mxu0 %v210_v0 }
  0x12   :  { %188 = vmatpush3.bf16.msra.mxu0 %v205_v5 }
  0x13   :  { %189 = vmatprep.subr.bf16.mxu0 %v210_v0 }
  0x16   :  { %190 = vmatpush3.bf16.msra.mxu0 %v206_v6 }
  0x17   :  { %191 = vmatprep.subr.bf16.mxu0 %v210_v0 }
  0x1a   :  { %192 = vmatpush3.bf16.msra.mxu0 %v207_v7 }
  0x1b   :  { %193 = vmatprep.subr.bf16.mxu0 %v210_v0 }
  0x1e   :  { %194 = vmatpush3.bf16.msra.mxu0 %v208_v8 }
  0x21   :  { %196 = vmatmul.mubr.bf16.vlgmr.msra.gmra.mrb[0].mxu0 %v209_v9 }
  0xf4   :  { %v129_v10 = vpop.f32.mrb[0].mxu0 }
  0xf5   :  { %v197_v12 = vpop.f32.mrb[1].mxu0  ;;  %v152_v14 = vadd.f32 %v169_v11, %v129_v10 }
  0xf6   :  { %v132_v13 = vpop.f32.mrb[2].mxu0 }
  0xf7   :  { %v198_v15 = vpop.f32.mrb[3].mxu0  ;;  %154 = vst [vmem:[%s271_s3] sm:$0xff] %v152_v14  ;;  %v153_v16 = vadd.f32 %v169_v11, %v132_v13 }
  0xf9   :  { %155 = vst [vmem:[%s271_s3 + $0x8] sm:$0xff] %v153_v16 }

</bundles_post_ra>
